<compile_context>
chip_gen: v5e
topology: v5e:2x2
jax: 0.10.0
libtpu: 0.0.40
codegen_flags: <defaults>
</compile_context>

<pallas_src>
import math

import jax
import jax.numpy as jnp
from jax import lax
from jax.experimental import pallas as pl
from jax.experimental.pallas import tpu as pltpu


_TARGET_TILE_BYTES = 4 * 1024 * 1024   # ~4 MiB input tile per grid step
_MAX_PACK = 16                         # cap on rows packed per lane-dense row


# ------------------------------- kernels -----------------------------------


def _make_plain_kernel(TB):
    """(TB, CD, TH) -> (TB, TH, CD); used when CD is already lane-dense."""
    def kernel(x_ref, o_ref):
        def body(t, carry):
            o_ref[t] = x_ref[t].T              # 2-D transpose on the XLU
            return carry
        lax.fori_loop(0, TB, body, 0, unroll=TB <= 4)
    return kernel


def _make_packed_kernel(TB, CD, TH, k):
    """(TB, CD, TH) -> (TB, TH//k, k*CD), lane-dense last dim.

    out[t, p, s*CD + cd] = x[t, cd, p*k + s]   (pure regrouping of x[t].T)
    Realized with well-supported ops only: transpose into a VMEM scratch,
    k sublane-strided reads, k static lane-slice stores.
    """
    TP = TH // k

    def kernel(x_ref, o_ref, xt_ref):
        def body(t, carry):
            xt_ref[...] = x_ref[t].T           # (TH, CD) scratch, XLU transpose
            for s in range(k):                 # static, k <= _MAX_PACK
                o_ref[t, :, s * CD:(s + 1) * CD] = xt_ref[pl.ds(s, TP, stride=k), :]
            return carry
        lax.fori_loop(0, TB, body, 0, unroll=TB <= 4)
    return kernel


# ----------------------------- tiling policy --------------------------------


def _sublane_granule(itemsize):
    # 8 rows for 4-byte dtypes, 16 for 2-byte, 32 for 1-byte.
    return 8 * max(1, 4 // itemsize)


def _pack_factor(CD, HW):
    """Output rows packed per lane-dense row; 1 disables packing."""
    if CD % 128 == 0:
        return 1                               # already lane-dense
    k = 128 // math.gcd(CD, 128)               # smallest k with (k*CD) % 128 == 0
    if k > _MAX_PACK or HW % k != 0:
        return 1                               # must stay a pure regrouping
    return k


def _choose_tiles(B, CD, HW, itemsize, k):
    """Pick (TB, TH): examples per grid step and H*W tile width."""
    slab = CD * HW * itemsize                  # bytes of one example (CD, HW)

    # Batch grouping: largest divisor of B whose grouped slab is near the
    # target tile size (amortizes the ~0.35us fixed per-step overhead).
    if slab >= _TARGET_TILE_BYTES:
        TB = 1
    else:
        want = min(B, max(1, _TARGET_TILE_BYTES // slab))
        TB = max(d for d in range(1, want + 1) if B % d == 0)

    # H*W tiling: only needed when a single example exceeds the target
    # (bounds VMEM and gives single-example workloads >= 2 pipelined steps).
    TH = HW
    if TB == 1 and slab > _TARGET_TILE_BYTES:
        step = math.lcm(128, _sublane_granule(itemsize) * k)
        max_th = min(HW, max(step, _TARGET_TILE_BYTES // (CD * itemsize)))
        best, t = 0, step
        while t <= max_th:
            if HW % t == 0:
                best = t
            t += step
        if best:
            TH = best
        # else: full-(CD, HW)-slab fallback; _vmem_limit_bytes() raises the
        # scoped limit toward physical capacity so it still compiles.
    return TB, TH


def _vmem_limit_bytes(working_set_bytes):
    """Generation-aware scoped-VMEM limit (64 MiB on v5e/v6e, 48 MiB on v7x)."""
    cap = 64 * 1024 * 1024                     # conservative default
    try:
        cap = int(getattr(pltpu.get_tpu_info(), "vmem_capacity_bytes", cap))
    except Exception:
        pass
    limit = min(64 * 1024 * 1024, (3 * cap) // 4)
    need = working_set_bytes + (4 << 20)       # headroom for Mosaic internals
    if need > limit:                           # full-slab fallback only
        limit = min(need, (15 * cap) // 16)
    return int(limit)


# ----------------------------- pallas wrapper -------------------------------


def _lane_pad(n):
    return ((n + 127) // 128) * 128


def _pallas_transpose(x2, TB, TH, k):
    """x2: (B, CD, HW) -> (B, HW//k, k*CD) if k > 1 else (B, HW, CD)."""
    B, CD, HW = x2.shape
    dtype = x2.dtype
    itemsize = jnp.dtype(dtype).itemsize
    grid = (B // TB, HW // TH)

    in_spec = pl.BlockSpec((TB, CD, TH), lambda bi, hi: (bi, 0, hi))
    in_block = TB * CD * _lane_pad(TH) * itemsize

    if k > 1:
        kernel = _make_packed_kernel(TB, CD, TH, k)
        out_shape = jax.ShapeDtypeStruct((B, HW // k, k * CD), dtype)
        out_spec = pl.BlockSpec((TB, TH // k, k * CD), lambda bi, hi: (bi, hi, 0))
        scratch = [pltpu.VMEM((TH, CD), dtype)]
        out_block = TB * (TH // k) * _lane_pad(k * CD) * itemsize
        scratch_bytes = TH * _lane_pad(CD) * itemsize
    else:
        kernel = _make_plain_kernel(TB)
        out_shape = jax.ShapeDtypeStruct((B, HW, CD), dtype)
        out_spec = pl.BlockSpec((TB, TH, CD), lambda bi, hi: (bi, hi, 0))
        scratch = []
        out_block = TB * TH * _lane_pad(CD) * itemsize
        scratch_bytes = 0

    working_set = 2 * (in_block + out_block) + scratch_bytes   # double-buffered

    return pl.pallas_call(
        kernel,
        out_shape=out_shape,
        grid_spec=pltpu.PrefetchScalarGridSpec(
            num_scalar_prefetch=0,
            grid=grid,
            in_specs=[in_spec],
            out_specs=out_spec,
            scratch_shapes=scratch,
        ),
        compiler_params=pltpu.CompilerParams(
            # Every grid step writes a distinct output block -> fully parallel;
            # v7x can shard the grid across its 2 TensorCores (neutral on
            # single-core v5e/v6e).
            dimension_semantics=("parallel", "parallel"),
            vmem_limit_bytes=_vmem_limit_bytes(working_set),
        ),
        cost_estimate=pl.CostEstimate(
            flops=0, transcendentals=0,
            bytes_accessed=2 * B * CD * HW * itemsize),
    )(x2)


# ------------------- one-time (cached) packed/plain choice -------------------


_FN_CACHE = {}


def _get_transpose_fn(B, CD, HW, dtype, TB, TH, k):
    """Packed vs. plain kernel, decided ONCE per shape signature.

    The decision is a compile-only probe (no execution, no host sync on the
    hot path); the chosen jitted callable is cached, so steady-state calls
    have no extra Python/compile overhead.
    """
    key = (B, CD, HW, jnp.dtype(dtype).name, TB, TH, k)
    fn = _FN_CACHE.get(key)
    if fn is not None:
        return fn

    if k > 1:
        packed = jax.jit(lambda x: _pallas_transpose(x, TB, TH, k))
        try:
            packed.lower(jax.ShapeDtypeStruct((B, CD, HW), dtype)).compile()
            _FN_CACHE[key] = packed
            return packed
        except Exception:
            pass   # this Mosaic build can't lower the packed relayout

    plain = jax.jit(lambda x: _pallas_transpose(x, TB, TH, 1))
    _FN_CACHE[key] = plain
    return plain


def flatten_caps(x):
    """x: (B, C, D, H, W) -> (B, C*H*W, D), matching FlattenCaps.forward."""
    B, C, D, H, W = x.shape
    CD, HW = C * D, H * W
    itemsize = jnp.dtype(x.dtype).itemsize

    # Free row-major regrouping of the HBM view: (B, C, D, H, W) -> (B, C*D, H*W).
    x2 = x.reshape(B, CD, HW)

    k = _pack_factor(CD, HW)
    TB, TH = _choose_tiles(B, CD, HW, itemsize, k)
    fn = _get_transpose_fn(B, CD, HW, x2.dtype, TB, TH, k)
    out = fn(x2)

    # Free row-major regroupings back to the PyTorch output layout:
    # (B, HW//k, k*CD) == (B, HW, CD) == (B, H*W*C, D) == (B, C*H*W, D).
    return out.reshape(B, C * H * W, D)


# --------------------------------- test -------------------------------------


if __name__ == "__main__":
    # Small capsule-style shapes: B=2, C=4 capsule types, D=8 capsule dims,
    # 16x16 spatial map  ->  output (2, 4*16*16, 8) = (2, 1024, 8).
    B, C, D, H, W = 2, 4, 8, 16, 16
    key = jax.random.PRNGKey(0)
    x = jax.random.normal(key, (B, C, D, H, W), dtype=jnp.float32)

    y = jax.block_until_ready(flatten_caps(x))

    # Pure-JAX reference of the PyTorch forward.
    ref = jnp.transpose(x, (0, 3, 4, 1, 2)).reshape(B, C * H * W, D)

    assert y.shape == (B, C * H * W, D), y.shape
    assert y.dtype == x.dtype
    assert jnp.array_equal(y, ref), "mismatch vs reference"

    print("KERNEL_OK")
</pallas_src>

<mosaic_0001>
module attributes {stable_mosaic.version = 11 : i64} {
  func.func @kernel(%arg0: i32, %arg1: i32, %arg2: memref<2x32x256xf32, #tpu.memory_space<vmem>>, %arg3: memref<2x256x32xf32, #tpu.memory_space<vmem>>) attributes {dimension_semantics = [#tpu.dimension_semantics<parallel>, #tpu.dimension_semantics<parallel>], iteration_bounds = array<i64: 1, 1>, scalar_prefetch = 0 : i64, scratch_operands = 0 : i64, tpu.core_type = #tpu.core_type<tc>, window_params = [{transform_indices = @transform_0, window_bounds = array<i64: 2, 32, 256>}, {transform_indices = @transform_1, window_bounds = array<i64: 2, 256, 32>}]} {
    %c0_i32 = arith.constant 0 : i32
    %0 = arith.index_cast %c0_i32 : i32 to index
    %c0 = arith.constant 0 : index
    %c0_0 = arith.constant 0 : index
    %1 = vector.load %arg2[%0, %c0, %c0_0] : memref<2x32x256xf32, #tpu.memory_space<vmem>>, vector<1x32x256xf32>
    %2 = vector.shape_cast %1 : vector<1x32x256xf32> to vector<32x256xf32>
    %3 = tpu.transpose %2, [1, 0] : vector<32x256xf32> -> vector<256x32xf32>
    %4 = arith.index_cast %c0_i32 : i32 to index
    %c0_1 = arith.constant 0 : index
    %c0_2 = arith.constant 0 : index
    %5 = vector.load %arg3[%4, %c0_1, %c0_2] : memref<2x256x32xf32, #tpu.memory_space<vmem>>, vector<1x256x32xf32>
    %6 = vector.shape_cast %5 : vector<1x256x32xf32> to vector<256x32xf32>
    %7 = vector.shape_cast %3 : vector<256x32xf32> to vector<1x256x32xf32>
    tpu.vector_store %arg3[%4, %c0_1, %c0_2], %7 {strides = array<i32>} : memref<2x256x32xf32, #tpu.memory_space<vmem>>, vector<1x256x32xf32>,
    %c1_i32 = arith.constant 1 : i32
    %8 = arith.index_cast %c1_i32 : i32 to index
    %c0_3 = arith.constant 0 : index
    %c0_4 = arith.constant 0 : index
    %9 = vector.load %arg2[%8, %c0_3, %c0_4] : memref<2x32x256xf32, #tpu.memory_space<vmem>>, vector<1x32x256xf32>
    %10 = vector.shape_cast %9 : vector<1x32x256xf32> to vector<32x256xf32>
    %11 = tpu.transpose %10, [1, 0] : vector<32x256xf32> -> vector<256x32xf32>
    %12 = arith.index_cast %c1_i32 : i32 to index
    %c0_5 = arith.constant 0 : index
    %c0_6 = arith.constant 0 : index
    %13 = vector.load %arg3[%12, %c0_5, %c0_6] : memref<2x256x32xf32, #tpu.memory_space<vmem>>, vector<1x256x32xf32>
    %14 = vector.shape_cast %13 : vector<1x256x32xf32> to vector<256x32xf32>
    %15 = vector.shape_cast %11 : vector<256x32xf32> to vector<1x256x32xf32>
    tpu.vector_store %arg3[%12, %c0_5, %c0_6], %15 {strides = array<i32>} : memref<2x256x32xf32, #tpu.memory_space<vmem>>, vector<1x256x32xf32>,
    %c2_i32 = arith.constant 2 : i32
    return
  }
  func.func @transform_0(%arg0: i32, %arg1: i32) -> (i32, i32, i32) {
    %c0_i32 = arith.constant 0 : i32
    %c0_i32_0 = arith.constant 0 : i32
    return %arg0, %c0_i32, %arg1 : i32, i32, i32
  }
  func.func @transform_1(%arg0: i32, %arg1: i32) -> (i32, i32, i32) {
    %c0_i32 = arith.constant 0 : i32
    %c0_i32_0 = arith.constant 0 : i32
    return %arg0, %arg1, %c0_i32 : i32, i32, i32
  }
}

</mosaic_0001>

<bundles_post_ra>
// kernel: _lambda_.1
= control target key start
LH: loop header
LB: loop body
LE: loop exit
PB: predicated region body
PF: predicated region fallthrough
CT: control target
= control target key end

     0   :  { %6 = vsyncpa [#allocation3], 0  ;;  %s302_s9 = smov [#allocation2]   ;;  %s303_s11 = smov 256   ;;  %s574_s0 = inlined_call_operand.hbm [shape: f32[2,32,256], index: 0, kind: input, shape index: {}]   ;;  %s575_s1 = inlined_call_operand.vmem [shape: f32[2,256,32], index: 1, kind: output, shape index: {}]  }
   0x1   :  { %s11_s8 = sshll.u32 %s574_s0, 4  ;;  %s13_s10 = sshll.u32 %s302_s9, 4  ;;  %s12_s8 = int_to_ptr.hbm [resolvable:$true] %s11_s8  ;;  %s14_s10 = int_to_ptr.vmem [resolvable:$true] %s13_s10 }
   0x2   :  { %s304_s12 = smov 16  }
   0x3   :  { %19 = dma.hbm_to_vmem [thread:$0]  %s12_s8, 2048, %s14_s10, [#allocation3], %s303_s11, %s303_s11, %s304_s12  }
   0x4   :  { %300 = dma.done.wait [#allocation3], 2048  }
   0x5   :  { %301 = vsyncadd [#allocation3], 4294965248  ;;  %v24_v0 = vld [vmem:[#allocation2] sm:$0xff]  ;;  %v25_v1 = vld [vmem:[#allocation2 + $0x8] sm:$0xff]  ;;  %vm96_vm0 = vcmask 261120  }
   0x6   :  { %32 = vxpose.xlu0.b32.start [1/4] (short) %v24_v0, 128  ;;  %64 = vxpose.xlu1.b32.start [1/4] (short) %v25_v1, 128  ;;  %v26_v2 = vld [vmem:[#allocation2 + $0x10] sm:$0xff]  ;;  %v28_v3 = vld [vmem:[#allocation2 + $0x20] sm:$0xff]  ;;  %v27_v5 = vld [vmem:[#allocation2 + $0x18] sm:$0xff] }
   0x7   :  { %v30_v4 = vld [vmem:[#allocation2 + $0x30] sm:$0xff]  ;;  %v130_v6 = vld [vmem:[#allocation2 + $0x40] sm:$0xff]  ;;  %v29_v7 = vld [vmem:[#allocation2 + $0x28] sm:$0xff] }
   0x8   :  { %138 = vxpose.xlu2.b32.start [1/4] (short) %v130_v6, 128  ;;  %v132_v8 = vld [vmem:[#allocation2 + $0x50] sm:$0xff]  ;;  %v31_v9 = vld [vmem:[#allocation2 + $0x38] sm:$0xff]  ;;  %v134_v10 = vld [vmem:[#allocation2 + $0x60] sm:$0xff] }
   0x9   :  { %v131_v11 = vld [vmem:[#allocation2 + $0x48] sm:$0xff]  ;;  %v136_v12 = vld [vmem:[#allocation2 + $0x70] sm:$0xff]  ;;  %v133_v13 = vld [vmem:[#allocation2 + $0x58] sm:$0xff] }
   0xa   :  { %v135_v14 = vld [vmem:[#allocation2 + $0x68] sm:$0xff]  ;;  %v137_v15 = vld [vmem:[#allocation2 + $0x78] sm:$0xff] }
   0xe   :  { %33 = vxpose.xlu0.b32.cont [2/4] (short) %v26_v2, 128  ;;  %65 = vxpose.xlu1.b32.cont [2/4] (short) %v27_v5, 128 }
  0x10   :  { %139 = vxpose.xlu2.b32.cont [2/4] (short) %v132_v8, 128 }
  0x16   :  { %34 = vxpose.xlu0.b32.cont [3/4] (short) %v28_v3, 128  ;;  %66 = vxpose.xlu1.b32.cont [3/4] (short) %v29_v7, 128 }
  0x18   :  { %140 = vxpose.xlu2.b32.cont [3/4] (short) %v134_v10, 128 }
  0x1e   :  { %35 = vxpose.xlu0.b32.end [4/4] (short) %v30_v4, 128  ;;  %67 = vxpose.xlu1.b32.end [4/4] (short) %v31_v9, 128 }
  0x20   :  { %141 = vxpose.xlu2.b32.end [4/4] (short) %v136_v12, 128 }
  0x86   :  { %170 = vxpose.xlu0.b32.start [1/4] (short) %v131_v11, 128 }
  0x8e   :  { %171 = vxpose.xlu0.b32.cont [2/4] (short) %v133_v13, 128 }
  0x96   :  { %172 = vxpose.xlu0.b32.cont [3/4] (short) %v135_v14, 128 }
  0x9e   :  { %173 = vxpose.xlu0.b32.end [4/4] (short) %v137_v15, 128 }
  0xa1   :  { %v154_v29 = vpop.trf.xlu2 }
  0xa2   :  { %240 = vst.msk [vmem:[%s575_s1 + $0x100] sm:$0xff] %vm96_vm0, %v154_v29 }
  0xa9   :  { %v155_v32 = vpop.trf.xlu2 }
  0xaa   :  { %v48_v16 = vpop.trf.xlu0  ;;  %v80_v28 = vpop.trf.xlu1  ;;  %241 = vst.msk [vmem:[%s575_s1 + $0x108] sm:$0xff] %vm96_vm0, %v155_v32 }
  0xab   :  { %97 = vst.msk [vmem:[%s575_s1] sm:$0xff] %vm96_vm0, %v48_v16 }
  0xac   :  { %113 = vst.msk [vmem:[%s575_s1 + $0x80] sm:$0xff] %vm96_vm0, %v80_v28 }
  0xb1   :  { %v156_v35 = vpop.trf.xlu2 }
  0xb2   :  { %v49_v17 = vpop.trf.xlu0  ;;  %v81_v31 = vpop.trf.xlu1  ;;  %242 = vst.msk [vmem:[%s575_s1 + $0x110] sm:$0xff] %vm96_vm0, %v156_v35 }
  0xb3   :  { %98 = vst.msk [vmem:[%s575_s1 + $0x8] sm:$0xff] %vm96_vm0, %v49_v17 }
  0xb4   :  { %114 = vst.msk [vmem:[%s575_s1 + $0x88] sm:$0xff] %vm96_vm0, %v81_v31 }
  0xb9   :  { %v157_v38 = vpop.trf.xlu2 }
  0xba   :  { %v50_v18 = vpop.trf.xlu0  ;;  %v82_v34 = vpop.trf.xlu1  ;;  %243 = vst.msk [vmem:[%s575_s1 + $0x118] sm:$0xff] %vm96_vm0, %v157_v38 }
  0xbb   :  { %99 = vst.msk [vmem:[%s575_s1 + $0x10] sm:$0xff] %vm96_vm0, %v50_v18 }
  0xbc   :  { %115 = vst.msk [vmem:[%s575_s1 + $0x90] sm:$0xff] %vm96_vm0, %v82_v34 }
  0xc1   :  { %v158_v41 = vpop.trf.xlu2 }
  0xc2   :  { %v51_v19 = vpop.trf.xlu0  ;;  %v83_v37 = vpop.trf.xlu1  ;;  %244 = vst.msk [vmem:[%s575_s1 + $0x120] sm:$0xff] %vm96_vm0, %v158_v41 }
  0xc3   :  { %100 = vst.msk [vmem:[%s575_s1 + $0x18] sm:$0xff] %vm96_vm0, %v51_v19 }
  0xc4   :  { %116 = vst.msk [vmem:[%s575_s1 + $0x98] sm:$0xff] %vm96_vm0, %v83_v37 }
  0xc9   :  { %v159_v44 = vpop.trf.xlu2 }
  0xca   :  { %v52_v20 = vpop.trf.xlu0  ;;  %v84_v40 = vpop.trf.xlu1  ;;  %245 = vst.msk [vmem:[%s575_s1 + $0x128] sm:$0xff] %vm96_vm0, %v159_v44 }
  0xcb   :  { %101 = vst.msk [vmem:[%s575_s1 + $0x20] sm:$0xff] %vm96_vm0, %v52_v20 }
  0xcc   :  { %117 = vst.msk [vmem:[%s575_s1 + $0xa0] sm:$0xff] %vm96_vm0, %v84_v40 }
  0xd1   :  { %v160_v47 = vpop.trf.xlu2 }
  0xd2   :  { %v53_v21 = vpop.trf.xlu0  ;;  %v85_v43 = vpop.trf.xlu1  ;;  %246 = vst.msk [vmem:[%s575_s1 + $0x130] sm:$0xff] %vm96_vm0, %v160_v47 }
  0xd3   :  { %102 = vst.msk [vmem:[%s575_s1 + $0x28] sm:$0xff] %vm96_vm0, %v53_v21 }
  0xd4   :  { %118 = vst.msk [vmem:[%s575_s1 + $0xa8] sm:$0xff] %vm96_vm0, %v85_v43 }
  0xd9   :  { %v161_v50 = vpop.trf.xlu2 }
  0xda   :  { %v54_v22 = vpop.trf.xlu0  ;;  %v86_v46 = vpop.trf.xlu1  ;;  %247 = vst.msk [vmem:[%s575_s1 + $0x138] sm:$0xff] %vm96_vm0, %v161_v50 }
  0xdb   :  { %103 = vst.msk [vmem:[%s575_s1 + $0x30] sm:$0xff] %vm96_vm0, %v54_v22 }
  0xdc   :  { %119 = vst.msk [vmem:[%s575_s1 + $0xb0] sm:$0xff] %vm96_vm0, %v86_v46 }
  0xe1   :  { %v162_v53 = vpop.trf.xlu2 }
  0xe2   :  { %v55_v23 = vpop.trf.xlu0  ;;  %v87_v49 = vpop.trf.xlu1  ;;  %248 = vst.msk [vmem:[%s575_s1 + $0x140] sm:$0xff] %vm96_vm0, %v162_v53 }
  0xe3   :  { %104 = vst.msk [vmem:[%s575_s1 + $0x38] sm:$0xff] %vm96_vm0, %v55_v23 }
  0xe4   :  { %120 = vst.msk [vmem:[%s575_s1 + $0xb8] sm:$0xff] %vm96_vm0, %v87_v49 }
  0xe9   :  { %v163_v56 = vpop.trf.xlu2 }
  0xea   :  { %v56_v24 = vpop.trf.xlu0  ;;  %v88_v52 = vpop.trf.xlu1  ;;  %249 = vst.msk [vmem:[%s575_s1 + $0x148] sm:$0xff] %vm96_vm0, %v163_v56 }
  0xeb   :  { %105 = vst.msk [vmem:[%s575_s1 + $0x40] sm:$0xff] %vm96_vm0, %v56_v24 }
  0xec   :  { %121 = vst.msk [vmem:[%s575_s1 + $0xc0] sm:$0xff] %vm96_vm0, %v88_v52 }
  0xf1   :  { %v164_v59 = vpop.trf.xlu2 }
  0xf2   :  { %v57_v25 = vpop.trf.xlu0  ;;  %v89_v55 = vpop.trf.xlu1  ;;  %250 = vst.msk [vmem:[%s575_s1 + $0x150] sm:$0xff] %vm96_vm0, %v164_v59 }
  0xf3   :  { %106 = vst.msk [vmem:[%s575_s1 + $0x48] sm:$0xff] %vm96_vm0, %v57_v25 }
  0xf4   :  { %122 = vst.msk [vmem:[%s575_s1 + $0xc8] sm:$0xff] %vm96_vm0, %v89_v55 }
  0xf9   :  { %v165_v62 = vpop.trf.xlu2 }
  0xfa   :  { %v58_v26 = vpop.trf.xlu0  ;;  %v90_v58 = vpop.trf.xlu1  ;;  %251 = vst.msk [vmem:[%s575_s1 + $0x158] sm:$0xff] %vm96_vm0, %v165_v62 }
  0xfb   :  { %107 = vst.msk [vmem:[%s575_s1 + $0x50] sm:$0xff] %vm96_vm0, %v58_v26 }
  0xfc   :  { %123 = vst.msk [vmem:[%s575_s1 + $0xd0] sm:$0xff] %vm96_vm0, %v90_v58 }
 0x101   :  { %v166_v1 = vpop.trf.xlu2 }
 0x102   :  { %v59_v27 = vpop.trf.xlu0  ;;  %v91_v61 = vpop.trf.xlu1  ;;  %252 = vst.msk [vmem:[%s575_s1 + $0x160] sm:$0xff] %vm96_vm0, %v166_v1 }
 0x103   :  { %108 = vst.msk [vmem:[%s575_s1 + $0x58] sm:$0xff] %vm96_vm0, %v59_v27 }
 0x104   :  { %124 = vst.msk [vmem:[%s575_s1 + $0xd8] sm:$0xff] %vm96_vm0, %v91_v61 }
 0x109   :  { %v167_v4 = vpop.trf.xlu2 }
 0x10a   :  { %v60_v30 = vpop.trf.xlu0  ;;  %v92_v0 = vpop.trf.xlu1  ;;  %253 = vst.msk [vmem:[%s575_s1 + $0x168] sm:$0xff] %vm96_vm0, %v167_v4 }
 0x10b   :  { %109 = vst.msk [vmem:[%s575_s1 + $0x60] sm:$0xff] %vm96_vm0, %v60_v30 }
 0x10c   :  { %125 = vst.msk [vmem:[%s575_s1 + $0xe0] sm:$0xff] %vm96_vm0, %v92_v0 }
 0x111   :  { %v168_v7 = vpop.trf.xlu2 }
 0x112   :  { %v61_v33 = vpop.trf.xlu0  ;;  %v93_v3 = vpop.trf.xlu1  ;;  %254 = vst.msk [vmem:[%s575_s1 + $0x170] sm:$0xff] %vm96_vm0, %v168_v7 }
 0x113   :  { %110 = vst.msk [vmem:[%s575_s1 + $0x68] sm:$0xff] %vm96_vm0, %v61_v33 }
 0x114   :  { %126 = vst.msk [vmem:[%s575_s1 + $0xe8] sm:$0xff] %vm96_vm0, %v93_v3 }
 0x119   :  { %v169_v10 = vpop.trf.xlu2 }
 0x11a   :  { %v62_v36 = vpop.trf.xlu0  ;;  %v94_v6 = vpop.trf.xlu1  ;;  %255 = vst.msk [vmem:[%s575_s1 + $0x178] sm:$0xff] %vm96_vm0, %v169_v10 }
 0x11b   :  { %111 = vst.msk [vmem:[%s575_s1 + $0x70] sm:$0xff] %vm96_vm0, %v62_v36 }
 0x11c   :  { %127 = vst.msk [vmem:[%s575_s1 + $0xf0] sm:$0xff] %vm96_vm0, %v94_v6 }
 0x122   :  { %v63_v39 = vpop.trf.xlu0  ;;  %v95_v9 = vpop.trf.xlu1 }
 0x123   :  { %112 = vst.msk [vmem:[%s575_s1 + $0x78] sm:$0xff] %vm96_vm0, %v63_v39 }
 0x124   :  { %128 = vst.msk [vmem:[%s575_s1 + $0xf8] sm:$0xff] %vm96_vm0, %v95_v9 }
 0x12a   :  { %v186_v42 = vpop.trf.xlu0 }
 0x12b   :  { %256 = vst.msk [vmem:[%s575_s1 + $0x180] sm:$0xff] %vm96_vm0, %v186_v42 }
 0x132   :  { %v187_v45 = vpop.trf.xlu0 }
 0x133   :  { %257 = vst.msk [vmem:[%s575_s1 + $0x188] sm:$0xff] %vm96_vm0, %v187_v45 }
 0x13a   :  { %v188_v48 = vpop.trf.xlu0 }
 0x13b   :  { %258 = vst.msk [vmem:[%s575_s1 + $0x190] sm:$0xff] %vm96_vm0, %v188_v48 }
 0x142   :  { %v189_v51 = vpop.trf.xlu0 }
 0x143   :  { %259 = vst.msk [vmem:[%s575_s1 + $0x198] sm:$0xff] %vm96_vm0, %v189_v51 }
 0x14a   :  { %v190_v54 = vpop.trf.xlu0 }
 0x14b   :  { %260 = vst.msk [vmem:[%s575_s1 + $0x1a0] sm:$0xff] %vm96_vm0, %v190_v54 }
 0x152   :  { %v191_v57 = vpop.trf.xlu0 }
 0x153   :  { %261 = vst.msk [vmem:[%s575_s1 + $0x1a8] sm:$0xff] %vm96_vm0, %v191_v57 }
 0x15a   :  { %v192_v60 = vpop.trf.xlu0 }
 0x15b   :  { %262 = vst.msk [vmem:[%s575_s1 + $0x1b0] sm:$0xff] %vm96_vm0, %v192_v60 }
 0x162   :  { %v193_v63 = vpop.trf.xlu0 }
 0x163   :  { %263 = vst.msk [vmem:[%s575_s1 + $0x1b8] sm:$0xff] %vm96_vm0, %v193_v63 }
 0x16a   :  { %v194_v2 = vpop.trf.xlu0 }
 0x16b   :  { %264 = vst.msk [vmem:[%s575_s1 + $0x1c0] sm:$0xff] %vm96_vm0, %v194_v2 }
 0x172   :  { %v195_v5 = vpop.trf.xlu0 }
 0x173   :  { %265 = vst.msk [vmem:[%s575_s1 + $0x1c8] sm:$0xff] %vm96_vm0, %v195_v5 }
 0x17a   :  { %v196_v8 = vpop.trf.xlu0 }
 0x17b   :  { %266 = vst.msk [vmem:[%s575_s1 + $0x1d0] sm:$0xff] %vm96_vm0, %v196_v8 }
 0x182   :  { %v197_v11 = vpop.trf.xlu0 }
 0x183   :  { %267 = vst.msk [vmem:[%s575_s1 + $0x1d8] sm:$0xff] %vm96_vm0, %v197_v11 }
 0x18a   :  { %v198_v12 = vpop.trf.xlu0 }
 0x18b   :  { %268 = vst.msk [vmem:[%s575_s1 + $0x1e0] sm:$0xff] %vm96_vm0, %v198_v12 }
 0x192   :  { %v199_v13 = vpop.trf.xlu0 }
 0x193   :  { %269 = vst.msk [vmem:[%s575_s1 + $0x1e8] sm:$0xff] %vm96_vm0, %v199_v13 }
 0x19a   :  { %v200_v14 = vpop.trf.xlu0 }
 0x19b   :  { %270 = vst.msk [vmem:[%s575_s1 + $0x1f0] sm:$0xff] %vm96_vm0, %v200_v14 }
 0x1a2   :  { %v201_v15 = vpop.trf.xlu0 }
 0x1a3   :  { %271 = vst.msk [vmem:[%s575_s1 + $0x1f8] sm:$0xff] %vm96_vm0, %v201_v15 }
 0x1a4   :  { %239 = vsyncpa [#allocation3], 1 }

</bundles_post_ra>
